<compile_context>
chip_gen: v7x
topology: tpu7x:2x2x1
jax: 0.10.0
libtpu: 0.0.40
codegen_flags: <defaults>
</compile_context>

<pallas_src>
import jax
import jax.numpy as jnp
from jax.experimental import pallas as pl
from jax.experimental.pallas import tpu as pltpu


def cbam_kernel(x_ref, w1_ref, w2_ref, mmax_ref, mavg_ref, bsa_ref, o_ref):
    """One batch tile in native token layout: x_ref is (bb, H*W, C)."""
    x = x_ref[...].astype(jnp.float32)                     # (bb, N, C)
    bb, N, C = x.shape
    inv_hw = 1.0 / N                                       # reciprocal constants,
    inv_c = 1.0 / C                                        # no runtime divides
    mxu = w1_ref.dtype                                     # bf16 MXU operands

    # ---- Channel attention: global max/avg pool over H*W + shared 1x1 MLP ----
    mx = jnp.max(x, axis=1)                                # (bb, C)  sublane reduce
    av = jnp.sum(x, axis=1) * inv_hw                       # (bb, C)
    p = jnp.concatenate([mx, av], axis=0).astype(mxu)      # (2*bb, C): fused SE pass
    h = jnp.maximum(
        jnp.dot(p, w1_ref[...], preferred_element_type=jnp.float32), 0.0)
    z = jnp.dot(h.astype(mxu), w2_ref[...],
                preferred_element_type=jnp.float32)        # (2*bb, C)
    ca = jax.nn.sigmoid(z[:bb] + z[bb:])                   # (bb, C)
    out = x * ca[:, None, :]                               # broadcast over tokens

    # ---- Spatial attention: channel max/mean maps + KxK conv as two MXU dots ----
    smax = jnp.max(out, axis=-1)                           # (bb, N)  lane reduce
    savg = jnp.sum(out, axis=-1) * inv_c                   # (bb, N)
    acc = (jnp.dot(smax.astype(mxu), mmax_ref[...],
                   preferred_element_type=jnp.float32)
           + jnp.dot(savg.astype(mxu), mavg_ref[...],
                     preferred_element_type=jnp.float32)
           + bsa_ref[0])                                   # (bb, N)
    sa = jax.nn.sigmoid(acc)

    # residual: out * sa + x   (sa broadcasts over the channel/lane axis)
    o_ref[...] = (out * sa[:, :, None] + x).astype(o_ref.dtype)


def _spatial_conv_matrices(wsa, H, W):
    """(2, K, K) 'same' spatial conv -> two (H*W, H*W) Toeplitz matmul matrices.

    Matrix 0 multiplies the channel-MAX map, matrix 1 the channel-MEAN map,
    matching torch.cat([max_result, avg_result], dim=1) in SpatialAttention.
    Pure weight preprocessing (independent of x).
    """
    K = wsa.shape[-1]
    pad = K // 2
    N = H * W
    dy = jnp.arange(H)[:, None] - jnp.arange(H)[None, :] + pad   # (H_in, H_out)
    dx = jnp.arange(W)[:, None] - jnp.arange(W)[None, :] + pad   # (W_in, W_out)
    vy = (dy >= 0) & (dy < K)
    vx = (dx >= 0) & (dx < K)
    dyc = jnp.clip(dy, 0, K - 1)
    dxc = jnp.clip(dx, 0, K - 1)
    valid = (vy[:, None, :, None] & vx[None, :, None, :]).astype(wsa.dtype)

    def one(w2d):   # -> (H_in, W_in, H_out, W_out) -> (N_in, N_out)
        return (w2d[dyc[:, None, :, None], dxc[None, :, None, :]] * valid).reshape(N, N)

    return one(wsa[0]), one(wsa[1])


def precompute_cbam_weights(w1, w2, wsa, H, W, mxu_dtype=jnp.bfloat16):
    """One-time weight preprocessing, hoisted off the forward critical path.

    w1 = se[0].weight.reshape(Cr, C).T -> (C, Cr); w2 = se[2].weight.reshape(C, Cr).T
    -> (Cr, C); wsa = sa.conv.weight.squeeze(0) -> (2, K, K).
    Returns bf16 MXU operands (f32 accumulation happens in the kernel).
    """
    mmax, mavg = _spatial_conv_matrices(wsa, H, W)
    return (w1.astype(mxu_dtype), w2.astype(mxu_dtype),
            mmax.astype(mxu_dtype), mavg.astype(mxu_dtype))


def cbam_block(x, H, W, w1, w2, mmax, mavg, bsa, *, batch_block=None):
    """x: (B, H*W, C) -> (B, H*W, C), matching CBAMBlock.forward (use_cls_token=False)."""
    B, Ntok, C = x.shape
    assert Ntok == H * W
    assert bsa.shape == (1,), "spatial conv bias must be a single scalar"
    N = H * W
    Cr = w1.shape[1]

    if batch_block is None:
        # VMEM-budgeted batch tile: keep the (double-buffered) x + out tiles
        # within ~8 MiB.  At tiny B this resolves to bb = B -> grid=(1,): do NOT
        # split a latency-bound ~16 KiB problem across grid steps / TensorCores.
        per_batch_bytes = 2 * N * C * x.dtype.itemsize
        bb = max(1, min(B, (8 << 20) // max(1, per_batch_bytes)))
        while B % bb:
            bb -= 1
    else:
        bb = batch_block
        assert B % bb == 0

    flops = int(8 * B * C * Cr + 4 * B * N * N + 8 * B * C * N)
    transcendentals = int(B * (C + N))
    bytes_accessed = int(x.dtype.itemsize * 2 * B * N * C
                         + mmax.dtype.itemsize * (2 * N * N + 2 * C * Cr) + 4)

    return pl.pallas_call(
        cbam_kernel,
        out_shape=jax.ShapeDtypeStruct((B, N, C), x.dtype),
        grid=(B // bb,),
        in_specs=[
            pl.BlockSpec((bb, N, C), lambda i: (i, 0, 0)),
            pl.BlockSpec((C, Cr), lambda i: (0, 0)),
            pl.BlockSpec((Cr, C), lambda i: (0, 0)),
            pl.BlockSpec((N, N), lambda i: (0, 0)),
            pl.BlockSpec((N, N), lambda i: (0, 0)),
            pl.BlockSpec(memory_space=pltpu.MemorySpace.SMEM),   # conv bias scalar
        ],
        out_specs=pl.BlockSpec((bb, N, C), lambda i: (i, 0, 0)),
        compiler_params=pltpu.CompilerParams(dimension_semantics=("parallel",)),
        cost_estimate=pl.CostEstimate(flops=flops, transcendentals=transcendentals,
                                      bytes_accessed=bytes_accessed),
    )(x, w1, w2, mmax, mavg, bsa)


def cbam_reference(x, H, W, w1, w2, wsa, bsa):
    """Pure-JAX f32 reference mirroring the PyTorch forward, for validation."""
    B, Ntok, C = x.shape
    xs = x.reshape(B, H, W, C)
    mx = xs.max(axis=(1, 2))
    av = xs.mean(axis=(1, 2))

    def se(v):
        return jnp.maximum(v @ w1, 0.0) @ w2

    ca = jax.nn.sigmoid(se(mx) + se(av))
    out = xs * ca[:, None, None, :]
    smax = out.max(axis=3)
    savg = out.mean(axis=3)
    K = wsa.shape[-1]
    pad = K // 2
    pm = jnp.pad(smax, ((0, 0), (pad, pad), (pad, pad)))
    pa = jnp.pad(savg, ((0, 0), (pad, pad), (pad, pad)))
    acc = jnp.full((B, H, W), bsa[0], jnp.float32)
    for ky in range(K):
        for kx in range(K):
            acc = (acc
                   + wsa[0, ky, kx] * pm[:, ky:ky + H, kx:kx + W]
                   + wsa[1, ky, kx] * pa[:, ky:ky + H, kx:kx + W])
    sa = jax.nn.sigmoid(acc)
    res = out * sa[..., None] + xs
    return res.reshape(B, Ntok, C)


if __name__ == "__main__":
    # Small shapes consistent with the module: channel=32, reduction=8,
    # kernel_size=7, H=W=8 so x has shape (B, H*W, C) = (2, 64, 32).
    B, C, H, W = 2, 32, 8, 8
    reduction, K = 8, 7
    Cr = C // reduction

    key = jax.random.PRNGKey(0)
    k1, k2, k3, kx = jax.random.split(key, 4)

    # Deterministic kaiming-normal-like (fan_out) init, stored as matmul matrices.
    w1 = jax.random.normal(k1, (C, Cr), jnp.float32) * (2.0 / Cr) ** 0.5
    w2 = jax.random.normal(k2, (Cr, C), jnp.float32) * (2.0 / C) ** 0.5
    # Spatial conv weight: PyTorch (1, 2, K, K) squeezed to (2, K, K); bias -> 0.
    wsa = jax.random.normal(k3, (2, K, K), jnp.float32) * (2.0 / (K * K)) ** 0.5
    bsa = jnp.zeros((1,), jnp.float32)

    x = jax.random.normal(kx, (B, H * W, C), jnp.float32)

    # One-time weight preprocessing (Toeplitz matrices + bf16 MXU casts),
    # hoisted off the forward critical path.
    w1_b, w2_b, mmax, mavg = precompute_cbam_weights(w1, w2, wsa, H, W)

    out = jax.block_until_ready(cbam_block(x, H, W, w1_b, w2_b, mmax, mavg, bsa))
    ref = jax.block_until_ready(cbam_reference(x, H, W, w1, w2, wsa, bsa))

    assert out.shape == (B, H * W, C)
    # bf16 MXU operands with f32 accumulation vs an all-f32 reference: tolerance
    # widened deliberately (sigmoid gates keep the error small but non-zero).
    assert jnp.allclose(out, ref, atol=5e-2, rtol=5e-2), "mismatch vs. reference"
    print("KERNEL_OK")
</pallas_src>

<mosaic_0001>
module attributes {stable_mosaic.version = 11 : i64} {
  func.func @cbam_kernel(%arg0: i32, %arg1: memref<2x64x32xf32, #tpu.memory_space<vmem>>, %arg2: memref<32x4xbf16, #tpu.memory_space<vmem>>, %arg3: memref<4x32xbf16, #tpu.memory_space<vmem>>, %arg4: memref<64x64xbf16, #tpu.memory_space<vmem>>, %arg5: memref<64x64xbf16, #tpu.memory_space<vmem>>, %arg6: memref<1xf32, #tpu.memory_space<smem>>, %arg7: memref<2x64x32xf32, #tpu.memory_space<vmem>>) attributes {dimension_semantics = [#tpu.dimension_semantics<parallel>], iteration_bounds = array<i64: 1>, scalar_prefetch = 0 : i64, scratch_operands = 0 : i64, tpu.core_type = #tpu.core_type<tc>, window_params = [{transform_indices = @transform_0, window_bounds = array<i64: 2, 64, 32>}, {pipeline_mode = #tpu.pipeline_mode<synchronous>, transform_indices = @transform_1, window_bounds = array<i64: 32, 4>}, {pipeline_mode = #tpu.pipeline_mode<synchronous>, transform_indices = @transform_2, window_bounds = array<i64: 4, 32>}, {pipeline_mode = #tpu.pipeline_mode<synchronous>, transform_indices = @transform_3, window_bounds = array<i64: 64, 64>}, {pipeline_mode = #tpu.pipeline_mode<synchronous>, transform_indices = @transform_4, window_bounds = array<i64: 64, 64>}, {transform_indices = @transform_5, window_bounds = array<i64: 1>}, {transform_indices = @transform_6, window_bounds = array<i64: 2, 64, 32>}]} {
    %c0 = arith.constant 0 : index
    %c0_0 = arith.constant 0 : index
    %c0_1 = arith.constant 0 : index
    %0 = vector.load %arg1[%c0, %c0_0, %c0_1] : memref<2x64x32xf32, #tpu.memory_space<vmem>>, vector<2x64x32xf32>
    %cst = arith.constant dense<0xFF800000> : vector<2x32xf32>
    %1 = vector.multi_reduction <maximumf>, %0, %cst [1] : vector<2x64x32xf32> to vector<2x32xf32>
    %cst_2 = arith.constant dense<0.000000e+00> : vector<2x32xf32>
    %2 = vector.multi_reduction <add>, %0, %cst_2 [1] : vector<2x64x32xf32> to vector<2x32xf32>
    %cst_3 = arith.constant 1.562500e-02 : f32
    %3 = vector.broadcast %cst_3 : f32 to vector<2x32xf32>
    %4 = arith.mulf %2, %3 : vector<2x32xf32>
    %5 = tpu.concatenate %1, %4 in 0 : vector<2x32xf32>, vector<2x32xf32> -> vector<4x32xf32>
    %6 = arith.truncf %5 : vector<4x32xf32> to vector<4x32xbf16>
    %c0_4 = arith.constant 0 : index
    %c0_5 = arith.constant 0 : index
    %7 = vector.load %arg2[%c0_4, %c0_5] : memref<32x4xbf16, #tpu.memory_space<vmem>>, vector<32x4xbf16>
    %cst_6 = arith.constant dense<0.000000e+00> : vector<4x4xf32>
    %8 = tpu.matmul %6, %7, %cst_6 {dimension_numbers = #tpu.dot_dimension_numbers<[1], [0], [0], [1], [0, 0, 1, 1], [], []>} : vector<4x32xbf16>, vector<32x4xbf16>, vector<4x4xf32> -> vector<4x4xf32>
    %cst_7 = arith.constant 0.000000e+00 : f32
    %9 = vector.broadcast %cst_7 : f32 to vector<4x4xf32>
    %10 = arith.maximumf %8, %9 : vector<4x4xf32>
    %11 = arith.truncf %10 : vector<4x4xf32> to vector<4x4xbf16>
    %c0_8 = arith.constant 0 : index
    %c0_9 = arith.constant 0 : index
    %12 = vector.load %arg3[%c0_8, %c0_9] : memref<4x32xbf16, #tpu.memory_space<vmem>>, vector<4x32xbf16>
    %cst_10 = arith.constant dense<0.000000e+00> : vector<4x32xf32>
    %13 = tpu.matmul %11, %12, %cst_10 {dimension_numbers = #tpu.dot_dimension_numbers<[1], [0], [0], [1], [0, 0, 1, 1], [], []>} : vector<4x4xbf16>, vector<4x32xbf16>, vector<4x32xf32> -> vector<4x32xf32>
    %14 = vector.extract_strided_slice %13 {offsets = [0, 0], sizes = [2, 32], strides = [1, 1]} : vector<4x32xf32> to vector<2x32xf32>
    %15 = vector.extract_strided_slice %13 {offsets = [2, 0], sizes = [2, 32], strides = [1, 1]} : vector<4x32xf32> to vector<2x32xf32>
    %16 = arith.addf %14, %15 : vector<2x32xf32>
    %17 = arith.negf %16 : vector<2x32xf32>
    %18 = math.exp %17 : vector<2x32xf32>
    %cst_11 = arith.constant 1.000000e+00 : f32
    %19 = vector.broadcast %cst_11 : f32 to vector<2x32xf32>
    %20 = arith.addf %19, %18 : vector<2x32xf32>
    %21 = arith.divf %19, %20 : vector<2x32xf32>
    %22 = vector.shape_cast %21 : vector<2x32xf32> to vector<2x1x32xf32>
    %23 = vector.broadcast %22 : vector<2x1x32xf32> to vector<2x64x32xf32>
    %24 = arith.mulf %0, %23 : vector<2x64x32xf32>
    %cst_12 = arith.constant dense<0xFF800000> : vector<2x64xf32>
    %25 = vector.multi_reduction <maximumf>, %24, %cst_12 [2] : vector<2x64x32xf32> to vector<2x64xf32>
    %cst_13 = arith.constant dense<0.000000e+00> : vector<2x64xf32>
    %26 = vector.multi_reduction <add>, %24, %cst_13 [2] : vector<2x64x32xf32> to vector<2x64xf32>
    %cst_14 = arith.constant 3.125000e-02 : f32
    %27 = vector.broadcast %cst_14 : f32 to vector<2x64xf32>
    %28 = arith.mulf %26, %27 : vector<2x64xf32>
    %29 = arith.truncf %25 : vector<2x64xf32> to vector<2x64xbf16>
    %c0_15 = arith.constant 0 : index
    %c0_16 = arith.constant 0 : index
    %30 = vector.load %arg4[%c0_15, %c0_16] : memref<64x64xbf16, #tpu.memory_space<vmem>>, vector<64x64xbf16>
    %cst_17 = arith.constant dense<0.000000e+00> : vector<2x64xf32>
    %31 = tpu.matmul %29, %30, %cst_17 {dimension_numbers = #tpu.dot_dimension_numbers<[1], [0], [0], [1], [0, 0, 1, 1], [], []>} : vector<2x64xbf16>, vector<64x64xbf16>, vector<2x64xf32> -> vector<2x64xf32>
    %32 = arith.truncf %28 : vector<2x64xf32> to vector<2x64xbf16>
    %c0_18 = arith.constant 0 : index
    %c0_19 = arith.constant 0 : index
    %33 = vector.load %arg5[%c0_18, %c0_19] : memref<64x64xbf16, #tpu.memory_space<vmem>>, vector<64x64xbf16>
    %cst_20 = arith.constant dense<0.000000e+00> : vector<2x64xf32>
    %34 = tpu.matmul %32, %33, %cst_20 {dimension_numbers = #tpu.dot_dimension_numbers<[1], [0], [0], [1], [0, 0, 1, 1], [], []>} : vector<2x64xbf16>, vector<64x64xbf16>, vector<2x64xf32> -> vector<2x64xf32>
    %35 = arith.addf %31, %34 : vector<2x64xf32>
    %c0_21 = arith.constant 0 : index
    %36 = memref.load %arg6[%c0_21] : memref<1xf32, #tpu.memory_space<smem>>
    %37 = vector.broadcast %36 : f32 to vector<2x64xf32>
    %38 = arith.addf %35, %37 : vector<2x64xf32>
    %39 = arith.negf %38 : vector<2x64xf32>
    %40 = math.exp %39 : vector<2x64xf32>
    %cst_22 = arith.constant 1.000000e+00 : f32
    %41 = vector.broadcast %cst_22 : f32 to vector<2x64xf32>
    %42 = arith.addf %41, %40 : vector<2x64xf32>
    %43 = arith.divf %41, %42 : vector<2x64xf32>
    %44 = vector.shape_cast %43 : vector<2x64xf32> to vector<2x64x1xf32>
    %45 = vector.broadcast %44 : vector<2x64x1xf32> to vector<2x64x32xf32>
    %46 = arith.mulf %24, %45 : vector<2x64x32xf32>
    %47 = arith.addf %46, %0 : vector<2x64x32xf32>
    %c0_23 = arith.constant 0 : index
    %c0_24 = arith.constant 0 : index
    %c0_25 = arith.constant 0 : index
    %48 = vector.load %arg7[%c0_23, %c0_24, %c0_25] : memref<2x64x32xf32, #tpu.memory_space<vmem>>, vector<2x64x32xf32>
    tpu.vector_store %arg7[%c0_23, %c0_24, %c0_25], %47 {strides = array<i32>} : memref<2x64x32xf32, #tpu.memory_space<vmem>>, vector<2x64x32xf32>,
    return
  }
  func.func @transform_0(%arg0: i32) -> (i32, i32, i32) {
    %c0_i32 = arith.constant 0 : i32
    %c0_i32_0 = arith.constant 0 : i32
    %c0_i32_1 = arith.constant 0 : i32
    return %arg0, %c0_i32, %c0_i32_0 : i32, i32, i32
  }
  func.func @transform_1(%arg0: i32) -> (i32, i32) {
    %c0_i32 = arith.constant 0 : i32
    %c0_i32_0 = arith.constant 0 : i32
    %c0_i32_1 = arith.constant 0 : i32
    return %c0_i32, %c0_i32_0 : i32, i32
  }
  func.func @transform_2(%arg0: i32) -> (i32, i32) {
    %c0_i32 = arith.constant 0 : i32
    %c0_i32_0 = arith.constant 0 : i32
    %c0_i32_1 = arith.constant 0 : i32
    return %c0_i32, %c0_i32_0 : i32, i32
  }
  func.func @transform_3(%arg0: i32) -> (i32, i32) {
    %c0_i32 = arith.constant 0 : i32
    %c0_i32_0 = arith.constant 0 : i32
    %c0_i32_1 = arith.constant 0 : i32
    return %c0_i32, %c0_i32_0 : i32, i32
  }
  func.func @transform_4(%arg0: i32) -> (i32, i32) {
    %c0_i32 = arith.constant 0 : i32
    %c0_i32_0 = arith.constant 0 : i32
    %c0_i32_1 = arith.constant 0 : i32
    return %c0_i32, %c0_i32_0 : i32, i32
  }
  func.func @transform_5(%arg0: i32) -> i32 {
    %c0_i32 = arith.constant 0 : i32
    %c0_i32_0 = arith.constant 0 : i32
    return %c0_i32 : i32
  }
  func.func @transform_6(%arg0: i32) -> (i32, i32, i32) {
    %c0_i32 = arith.constant 0 : i32
    %c0_i32_0 = arith.constant 0 : i32
    %c0_i32_1 = arith.constant 0 : i32
    return %arg0, %c0_i32, %c0_i32_0 : i32, i32, i32
  }
}

</mosaic_0001>

<bundles_post_ra>
// kernel: tpu_custom_call.1
= control target key start
LH: loop header
LB: loop body
LE: loop exit
PB: predicated region body
PF: predicated region fallthrough
CT: control target
= control target key end

     0   :  { %v1044_v0 = vmov 0.0   ;;  %vm1045_vm0 = vmmov 0   ;;  %vm41_vm1 = vcmask 261120   ;;  %vm130_vm2 = vcmask 1041409   ;;  %s1623_s1 = inlined_call_operand.vmem [shape: bf16[32,4], index: 1, kind: input, shape index: {}]   ;;  %s1624_s0 = inlined_call_operand.vmem [shape: f32[2,64,32], index: 0, kind: input, shape index: {}]   ;;  %s1625_s2 = inlined_call_operand.vmem [shape: bf16[4,32], index: 2, kind: input, shape index: {}]   ;;  %s1626_s4 = inlined_call_operand.vmem [shape: bf16[64,64], index: 4, kind: input, shape index: {}]   ;;  %s1627_s3 = inlined_call_operand.vmem [shape: bf16[64,64], index: 3, kind: input, shape index: {}]   ;;  %s1628_s5 = inlined_call_operand.<no memory space> [shape: f32[1], index: 5, kind: input, shape index: {}]   ;;  %s1629_s6 = inlined_call_operand.vmem [shape: f32[2,64,32], index: 6, kind: output, shape index: {}]  }
   0x1   :  { %974 = vmatprep.subr.bf16.mxu0 %v1044_v0  ;;  %v1015_v1 = vld [vmem:[%s1623_s1] sm:$0xff]   ;;  %978 = vmatprep.mubr.msk.bf16.mxu0 %vm1045_vm0, %v1044_v0  ;;  %v1016_v2 = vld [vmem:[%s1623_s1 + $0x8] sm:$0xff]   ;;  %v1107_v5 = vld [vmem:[%s1624_s0 + $0x10] sm:$0xff]  ;;  %vm135_vm3 = vcmask 1043459   ;;  %vm138_vm4 = vcmask 1041408   ;;  %vm203_vm5 = vcmask 31744  }
   0x2   :  { %982 = vmatprep.subr.bf16.mxu1 %v1044_v0  ;;  %984 = vmatprep.mubr.msk.bf16.mxu1 %vm1045_vm0, %v1044_v0  ;;  %v1097_v3 = vld [vmem:[%s1624_s0] sm:$0xff]  ;;  %v1102_v4 = vld [vmem:[%s1624_s0 + $0x8] sm:$0xff]  ;;  %v1113_v6 = vld [vmem:[%s1624_s0 + $0x18] sm:$0xff]  ;;  %v44_v11 = vsel %vm41_vm1, %v1107_v5, -inf  ;;  %v87_v47 = vsel %vm41_vm1, %v1107_v5, 0.0  ;;  %vm488_vm6 = vcmask 130112  }
   0x3   :  { %975 = vmatpush3.bf16.msra.mxu0 %v1015_v1  ;;  %v1118_v7 = vld [vmem:[%s1624_s0 + $0x20] sm:$0xff]  ;;  %v1123_v8 = vld [vmem:[%s1624_s0 + $0x28] sm:$0xff]  ;;  %v42_v9 = vsel %vm41_vm1, %v1097_v3, -inf  ;;  %v43_v10 = vsel %vm41_vm1, %v1102_v4, -inf  ;;  %v1134_v12 = vld [vmem:[%s1624_s0 + $0x30] sm:$0xff]  ;;  %v46_v16 = vsel %vm41_vm1, %v1113_v6, -inf }
   0x4   :  { %976 = vmatprep.subr.bf16.mxu0 %v1044_v0  ;;  %v1139_v13 = vld [vmem:[%s1624_s0 + $0x38] sm:$0xff]  ;;  %v1144_v14 = vld [vmem:[%s1624_s0 + $0x40] sm:$0xff]  ;;  %v45_v15 = vmax.f32 %v42_v9, %v44_v11  ;;  %v48_v17 = vsel %vm41_vm1, %v1118_v7, -inf  ;;  %v50_v18 = vsel %vm41_vm1, %v1123_v8, -inf  ;;  %v1155_v19 = vld [vmem:[%s1624_s0 + $0x48] sm:$0xff]  ;;  %v47_v22 = vmax.f32 %v43_v10, %v46_v16 }
   0x5   :  { %v1160_v20 = vld [vmem:[%s1624_s0 + $0x50] sm:$0xff]  ;;  %v1165_v21 = vld [vmem:[%s1624_s0 + $0x58] sm:$0xff]  ;;  %v52_v23 = vsel %vm41_vm1, %v1134_v12, -inf  ;;  %v54_v24 = vsel %vm41_vm1, %v1139_v13, -inf  ;;  %v63_v25 = vsel %vm41_vm1, %v1144_v14, -inf  ;;  %v1176_v26 = vld [vmem:[%s1624_s0 + $0x60] sm:$0xff] }
   0x6   :  { %v49_v27 = vmax.f32 %v45_v15, %v48_v17  ;;  %v64_v28 = vsel %vm41_vm1, %v1155_v19, -inf  ;;  %v65_v29 = vsel %vm41_vm1, %v1160_v20, -inf  ;;  %v67_v30 = vsel %vm41_vm1, %v1165_v21, -inf  ;;  %v1187_v31 = vld [vmem:[%s1624_s0 + $0x68] sm:$0xff]  ;;  %v1192_v32 = vld [vmem:[%s1624_s0 + $0x70] sm:$0xff]  ;;  %v1197_v33 = vld [vmem:[%s1624_s0 + $0x78] sm:$0xff] }
   0x7   :  { %977 = vmatpush3.bf16.msra.mxu0 %v1016_v2  ;;  %v51_v34 = vmax.f32 %v47_v22, %v50_v18  ;;  %v66_v35 = vmax.f32 %v63_v25, %v65_v29  ;;  %v68_v36 = vmax.f32 %v64_v28, %v67_v30  ;;  %v69_v37 = vsel %vm41_vm1, %v1176_v26, -inf }
   0x8   :  { %1000 = vmatprep.subr.bf16.mxu0 %v1044_v0  ;;  %v53_v38 = vmax.f32 %v49_v27, %v52_v23  ;;  %v71_v39 = vsel %vm41_vm1, %v1187_v31, -inf  ;;  %v73_v40 = vsel %vm41_vm1, %v1192_v32, -inf  ;;  %v75_v41 = vsel %vm41_vm1, %v1197_v33, -inf }
   0x9   :  { %v55_v42 = vmax.f32 %v51_v34, %v54_v24  ;;  %v70_v43 = vmax.f32 %v66_v35, %v69_v37  ;;  %v72_v44 = vmax.f32 %v68_v36, %v71_v39  ;;  %v84_v45 = vsel %vm41_vm1, %v1097_v3, 0.0 }
   0xa   :  { %v85_v46 = vsel %vm41_vm1, %v1102_v4, 0.0  ;;  %v89_v52 = vsel %vm41_vm1, %v1113_v6, 0.0  ;;  %v105_v53 = vsel %vm41_vm1, %v1144_v14, 0.0  ;;  %v106_v56 = vsel %vm41_vm1, %v1155_v19, 0.0 }
   0xb   :  { %v74_v48 = vmax.f32 %v70_v43, %v73_v40  ;;  %v76_v49 = vmax.f32 %v72_v44, %v75_v41  ;;  %v86_v50 = vadd.f32 %v85_v46, %v84_v45  ;;  %v56_v51 = vmax.f32 %v53_v38, %v55_v42 }
   0xc   :  { %v91_v57 = vsel %vm41_vm1, %v1118_v7, 0.0  ;;  %v107_v58 = vadd.f32 %v106_v56, %v105_v53  ;;  %v108_v59 = vsel %vm41_vm1, %v1160_v20, 0.0  ;;  %v110_v61 = vsel %vm41_vm1, %v1165_v21, 0.0 }
   0xd   :  { %v77_v54 = vmax.f32 %v74_v48, %v76_v49  ;;  %v88_v55 = vadd.f32 %v87_v47, %v86_v50  ;;  %v57_v62 = vrot.slane %v56_v51, 4  ;;  %v93_v1 = vsel %vm41_vm1, %v1123_v8, 0.0 }
   0xe   :  { %v109_v2 = vadd.f32 %v108_v59, %v107_v58  ;;  %v112_v10 = vsel %vm41_vm1, %v1176_v26, 0.0  ;;  %v95_v11 = vsel %vm41_vm1, %v1134_v12, 0.0  ;;  %v114_v17 = vsel %vm41_vm1, %v1187_v31, 0.0 }
   0xf   :  { %v90_v60 = vadd.f32 %v89_v52, %v88_v55  ;;  %v78_v63 = vrot.slane %v77_v54, 4  ;;  %v58_v18 = vmax.f32 %v56_v51, %v57_v62  ;;  %v97_v23 = vsel %vm41_vm1, %v1139_v13, 0.0  ;;  %v202_v62 = vld [vmem:[%s1625_s2] sm:$0x3] }
  0x10   :  { %v111_v15 = vadd.f32 %v110_v61, %v109_v2  ;;  %v116_v27 = vsel %vm41_vm1, %v1192_v32, 0.0  ;;  %v118_v30 = vsel %vm41_vm1, %v1197_v33, 0.0  ;;  %vm495_vm7 = vcmask 195712  }
  0x11   :  { %v92_v9 = vadd.f32 %v91_v57, %v90_v60  ;;  %v79_v22 = vmax.f32 %v77_v54, %v78_v63  ;;  %v59_v34 = vrot.slane %v58_v18, 2  ;;  %v208_v63 = vsel %vm138_vm4, %v202_v62, 0 }
  0x12   :  { %v113_v24 = vadd.f32 %v112_v10, %v111_v15  ;;  %983 = vmatpush3.bf16.msra.mxu1 %v208_v63  ;;  %vm502_vm8 = vcmask 261312   ;;  %vm509_vm9 = vcmask 326912   ;;  %vm516_vm10 = vcmask 392512  }
  0x13   :  { %v94_v16 = vadd.f32 %v93_v1, %v92_v9  ;;  %v80_v35 = vrot.slane %v79_v22, 2  ;;  %v60_v40 = vmax.f32 %v58_v18, %v59_v34  ;;  %988 = vmatprep.subr.bf16.mxu1 %v1044_v0  ;;  %v264_v34 = vlaneseq }
  0x14   :  { %v115_v28 = vadd.f32 %v114_v17, %v113_v24  ;;  %vm523_vm11 = vcmask 458112   ;;  %vm530_vm12 = vcmask 523712   ;;  %vm597_vm13 = vcmask 523264  }
  0x15   :  { %v96_v25 = vadd.f32 %v95_v11, %v94_v16  ;;  %v81_v41 = vmax.f32 %v79_v22, %v80_v35  ;;  %v61_v46 = vrot.slane %v60_v40, 1 }
  0x16   :  { %v117_v36 = vadd.f32 %v116_v27, %v115_v28 }
  0x17   :  { %v98_v29 = vadd.f32 %v97_v23, %v96_v25  ;;  %v82_v47 = vrot.slane %v81_v41, 1  ;;  %v62_v52 = vmax.f32 %v60_v40, %v61_v46 }
  0x18   :  { %v119_v38 = vadd.f32 %v118_v30, %v117_v36  ;;  %v1251_v36 = vshrl.u32 %v264_v34, 7 }
  0x19   :  { %v99_v37 = vrot.slane %v98_v29, 4  ;;  %v83_v53 = vmax.f32 %v81_v41, %v82_v47 }
  0x1a   :  { %v120_v42 = vrot.slane %v119_v38, 4  ;;  %v1255_v40 = vsub.s32 0, %v1251_v36 }
  0x1b   :  { %v100_v39 = vadd.f32 %v99_v37, %v98_v29  ;;  %v131_v58 = vsel %vm130_vm2, %v83_v53, %v62_v52  ;;  %v1046_v29 = vmov 1966171168  }
  0x1c   :  { %v121_v44 = vadd.f32 %v120_v42, %v119_v38  ;;  %v262_v30 = vunpack.c.l.s4 %v1046_v29 }
  0x1d   :  { %v101_v43 = vrot.slane %v100_v39, 2 }
  0x1e   :  { %v122_v48 = vrot.slane %v121_v44, 2  ;;  %v263_v35 = vunpack.c.0.s8 %v262_v30 }
  0x1f   :  { %v102_v45 = vadd.f32 %v101_v43, %v100_v39 }
  0x20   :  { %v123_v50 = vadd.f32 %v122_v48, %v121_v44  ;;  %v266_v37 = vsub.s32 %v263_v35, %v1251_v36 }
  0x21   :  { %v103_v49 = vrot.slane %v102_v45, 1 }
  0x22   :  { %v124_v54 = vrot.slane %v123_v50, 1 }
  0x23   :  { %v104_v51 = vadd.f32 %v103_v49, %v102_v45 }
  0x24   :  { %v125_v55 = vadd.f32 %v124_v54, %v123_v50 }
  0x25   :  { %v126_v56 = vmul.f32 0.015625, %v104_v51 }
  0x26   :  { %v127_v57 = vmul.f32 0.015625, %v125_v55 }
  0x28   :  { %v136_v59 = vsel %vm135_vm3, %v127_v57, %v126_v56 }
  0x29   :  { %v139_v60 = vsel %vm138_vm4, %v131_v58, %v136_v59 }
  0x2a   :  { %v140_v61 = vpack.c.bf16 %v139_v60, %v139_v60 }
  0x2c   :  { %979 = vmatmul.mubr.msk.bf16.vlgmr.msra.gmra.mrb[0].mxu0 %vm41_vm1, %v140_v61 }
  0x2d   :  { %1008 = vmatprep.mubr.msk.bf16.mxu0 %vm1045_vm0, %v1044_v0 }
  0xff   :  { %v194_v1 = vpop.f32.mrb[0].mxu0 }
 0x100   :  { %v200_v2 = vmax.f32 %v194_v1, 0.0  ;;  %v980_v9 = vpop.f32.mrb[1].mxu0 }
 0x101   :  { %v197_v10 = vpop.f32.mrb[2].mxu0 }
 0x102   :  { %v201_v11 = vpack.c.bf16 %v200_v2, %v200_v2  ;;  %v981_v15 = vpop.f32.mrb[3].mxu0 }
 0x104   :  { %985 = vmatmul.mubr.msk.bf16.vlgmr.msra.gmra.mrb[0].mxu1 %vm203_vm5, %v201_v11 }
 0x105   :  { %996 = vmatprep.mubr.msk.bf16.mxu1 %vm1045_vm0, %v1044_v0 }
 0x1d7   :  { %v244_v16 = vpop.f32.mrb[0].mxu1 }
 0x1d8   :  { %v251_v17 = vrot.slane %v244_v16, 2  ;;  %v986_v18 = vpop.f32.mrb[1].mxu1 }
 0x1d9   :  { %v247_v22 = vpop.f32.mrb[2].mxu1 }
 0x1da   :  { %v253_v23 = vadd.f32 %v251_v17, %v244_v16  ;;  %v987_v24 = vpop.f32.mrb[3].mxu1 }
 0x1dc   :  { %v947_v25 = vmul.f32 -1.442695, %v253_v23 }
 0x1de   :  { %1025 = vpow2.f32 %v947_v25 }
 0x1e8   :  { %v1026_v27 = vpop.eup %1025 }
 0x1e9   :  { %v257_v28 = vadd.f32 1.0, %v1026_v27 }
 0x1eb   :  { %1027 = vrcp.f32 %v257_v28 }
 0x1f5   :  { %v1028_v38 = vpop.eup %1027 }
 0x1f6   :  { %v267_v39 = vrot.slane %v1028_v38, %v266_v37 }
 0x1f8   :  { %v275_v41 = vrot.slane %v267_v39, %v266_v37  ;;  %v268_v53 = vcombine.high %v267_v39, %v267_v39  ;;  %v1018_v39 = vld [vmem:[%s1627_s3] sm:$0xff]  }
 0x1f9   :  { %1001 = vmatpush3.bf16.msra.mxu0 %v1018_v39 }
 0x1fa   :  { %v286_v42 = vrot.slane %v275_v41, %v1255_v40  ;;  %v282_v56 = vrot.slane %v268_v53, %v266_v37  ;;  %v1019_v41 = vld [vmem:[%s1626_s4 + $0x8] sm:$0xff]   ;;  %1002 = vmatprep.subr.bf16.mxu0 %v1044_v0 }
 0x1fc   :  { %v1259_v43 = vmul.f32 %v286_v42, %v1113_v6  ;;  %v1262_v44 = vmul.f32 %v286_v42, %v1097_v3  ;;  %v1269_v47 = vmul.f32 %v286_v42, %v1102_v4  ;;  %v1276_v49 = vmul.f32 %v286_v42, %v1107_v5 }
 0x1fd   :  { %v1283_v52 = vmul.f32 %v286_v42, %v1123_v8  ;;  %v1294_v8 = vmul.f32 %v286_v42, %v1139_v13  ;;  %v1297_v59 = vmul.f32 %v286_v42, %v1118_v7  ;;  %v290_v60 = vrot.slane %v282_v56, %v1255_v40 }
 0x1fe   :  { %v366_v45 = vsel %vm41_vm1, %v1259_v43, 0.0  ;;  %v357_v46 = vsel %vm41_vm1, %v1262_v44, 0.0  ;;  %v312_v48 = vsel %vm41_vm1, %v1269_v47, -inf  ;;  %v360_v6 = vsel %vm41_vm1, %v1269_v47, 0.0 }
 0x1ff   :  { %367 = vadd.xlane.f32.xlu1 %v366_v45  ;;  %358 = vadd.xlane.f32.xlu0 %v357_v46  ;;  %v318_v50 = vsel %vm41_vm1, %v1259_v43, -inf  ;;  %v363_v51 = vsel %vm41_vm1, %v1276_v49, 0.0  ;;  %v372_v54 = vsel %vm41_vm1, %v1283_v52, 0.0  ;;  %v309_v55 = vsel %vm41_vm1, %v1262_v44, -inf  ;;  %v1021_v45 = vld [vmem:[%s1626_s4 + $0x10] sm:$0xff]  }
 0x200   :  { %v324_v57 = vsel %vm41_vm1, %v1283_v52, -inf  ;;  %v315_v58 = vsel %vm41_vm1, %v1276_v49, -inf  ;;  %v378_v61 = vsel %vm41_vm1, %v1294_v8, 0.0  ;;  %v369_v62 = vsel %vm41_vm1, %v1297_v59, 0.0  ;;  %v1022_v46 = vld [vmem:[%s1627_s3 + $0x10] sm:$0xff]  }
 0x201   :  { %v330_v63 = vsel %vm41_vm1, %v1294_v8, -inf  ;;  %v321_v13 = vsel %vm41_vm1, %v1297_v59, -inf  ;;  %v1309_v1 = vmul.f32 %v286_v42, %v1134_v12  ;;  %v1312_v2 = vmul.f32 %v290_v60, %v1144_v14  ;;  %v1020_v42 = vld [vmem:[%s1627_s3 + $0x8] sm:$0xff]  }
 0x202   :  { %v1319_v11 = vmul.f32 %v290_v60, %v1155_v19  ;;  %v1326_v16 = vmul.f32 %v290_v60, %v1160_v20  ;;  %v1329_v17 = vmul.f32 %v290_v60, %v1165_v21  ;;  %v1344_v24 = vmul.f32 %v290_v60, %v1187_v31  ;;  %1003 = vmatpush3.bf16.msra.mxu0 %v1020_v42 }
 0x203   :  { %313 = vmax.xlane.f32.xlu1 %v312_v48  ;;  %361 = vadd.xlane.f32.xlu0 %v360_v6  ;;  %v375_v9 = vsel %vm41_vm1, %v1309_v1, 0.0  ;;  %v381_v10 = vsel %vm41_vm1, %v1312_v2, 0.0  ;;  %v327_v15 = vsel %vm41_vm1, %v1309_v1, -inf  ;;  %v333_v20 = vsel %vm41_vm1, %v1312_v2, -inf  ;;  %v1023_v48 = vld [vmem:[%s1626_s4 + $0x18] sm:$0xff]  }
 0x204   :  { %v384_v14 = vsel %vm41_vm1, %v1319_v11, 0.0  ;;  %v387_v19 = vsel %vm41_vm1, %v1326_v16, 0.0  ;;  %v390_v18 = vsel %vm41_vm1, %v1329_v17, 0.0  ;;  %v336_v22 = vsel %vm41_vm1, %v1319_v11, -inf  ;;  %1004 = vmatprep.subr.bf16.mxu0 %v1044_v0  ;;  %v1024_v6 = vld [vmem:[%s1627_s3 + $0x18] sm:$0xff]  }
 0x205   :  { %v342_v21 = vsel %vm41_vm1, %v1329_v17, -inf  ;;  %v339_v23 = vsel %vm41_vm1, %v1326_v16, -inf  ;;  %v1347_v25 = vmul.f32 %v290_v60, %v1176_v26  ;;  %v396_v27 = vsel %vm41_vm1, %v1344_v24, 0.0 }
 0x206   :  { %v348_v29 = vsel %vm41_vm1, %v1344_v24, -inf  ;;  %v1358_v30 = vmul.f32 %v290_v60, %v1197_v33  ;;  %v1361_v26 = vmul.f32 %v290_v60, %v1192_v32  ;;  %v1017_v32 = vld [vmem:[%s1626_s4] sm:$0xff]   ;;  %1005 = vmatpush3.bf16.msra.mxu0 %v1022_v46 }
 0x207   :  { %319 = vmax.xlane.f32.xlu1 %v318_v50  ;;  %364 = vadd.xlane.f32.xlu0 %v363_v51  ;;  %v393_v28 = vsel %vm41_vm1, %v1347_v25, 0.0  ;;  %v345_v31 = vsel %vm41_vm1, %v1347_v25, -inf }
 0x208   :  { %1631 = vst [vmem:[#allocation3_spill] sm:$0xff] %v1358_v30  ;;  %v402_v35 = vsel %vm41_vm1, %v1358_v30, 0.0  ;;  %v399_v37 = vsel %vm41_vm1, %v1361_v26, 0.0  ;;  %v354_v38 = vsel %vm41_vm1, %v1358_v30, -inf  ;;  %v351_v33 = vsel %vm41_vm1, %v1361_v26, -inf  ;;  %989 = vmatpush3.bf16.msra.mxu1 %v1017_v32  ;;  %1006 = vmatprep.subr.bf16.mxu0 %v1044_v0 }
 0x209   :  { %990 = vmatprep.subr.bf16.mxu1 %v1044_v0 }
 0x20a   :  { %1007 = vmatpush3.bf16.msra.mxu0 %v1024_v6 }
 0x20b   :  { %373 = vadd.xlane.f32.xlu1 %v372_v54  ;;  %310 = vmax.xlane.f32.xlu0 %v309_v55 }
 0x20c   :  { %991 = vmatpush3.bf16.msra.mxu1 %v1019_v41 }
 0x20d   :  { %992 = vmatprep.subr.bf16.mxu1 %v1044_v0 }
 0x20f   :  { %325 = vmax.xlane.f32.xlu1 %v324_v57  ;;  %316 = vmax.xlane.f32.xlu0 %v315_v58 }
 0x210   :  { %993 = vmatpush3.bf16.msra.mxu1 %v1021_v45 }
 0x211   :  { %994 = vmatprep.subr.bf16.mxu1 %v1044_v0  ;;  %v478_v0 = vand.u32 127, %v264_v34 }
 0x213   :  { %379 = vadd.xlane.f32.xlu1 %v378_v61  ;;  %370 = vadd.xlane.f32.xlu0 %v369_v62 }
 0x214   :  { %995 = vmatpush3.bf16.msra.mxu1 %v1023_v48 }
 0x217   :  { %331 = vmax.xlane.f32.xlu1 %v330_v63  ;;  %322 = vmax.xlane.f32.xlu0 %v321_v13 }
 0x21b   :  { %376 = vadd.xlane.f32.xlu0 %v375_v9  ;;  %382 = vadd.xlane.f32.xlu1 %v381_v10 }
 0x21f   :  { %328 = vmax.xlane.f32.xlu0 %v327_v15  ;;  %385 = vadd.xlane.f32.xlu1 %v384_v14 }
 0x223   :  { %388 = vadd.xlane.f32.xlu0 %v387_v19  ;;  %391 = vadd.xlane.f32.xlu1 %v390_v18 }
 0x227   :  { %337 = vmax.xlane.f32.xlu1 %v336_v22  ;;  %334 = vmax.xlane.f32.xlu0 %v333_v20  ;;  %v483_v20 = vadd.s32 4294967288, %v478_v0 }
 0x229   :  { %v1414_v34 = vsub.s32 %v483_v20, %v1251_v36 }
 0x22b   :  { %343 = vmax.xlane.f32.xlu1 %v342_v21  ;;  %340 = vmax.xlane.f32.xlu0 %v339_v23  ;;  %v490_v23 = vadd.s32 4294967280, %v478_v0 }
 0x22d   :  { %v1417_v39 = vsub.s32 %v490_v23, %v1251_v36 }
 0x22f   :  { %397 = vadd.xlane.f32.xlu1 %v396_v27  ;;  %394 = vadd.xlane.f32.xlu0 %v393_v28 }
 0x233   :  { %349 = vmax.xlane.f32.xlu1 %v348_v29  ;;  %346 = vmax.xlane.f32.xlu0 %v345_v31 }
 0x237   :  { %403 = vadd.xlane.f32.xlu1 %v402_v35  ;;  %400 = vadd.xlane.f32.xlu0 %v399_v37  ;;  %v497_v35 = vadd.s32 4294967272, %v478_v0 }
 0x239   :  { %v1420_v6 = vsub.s32 %v497_v35, %v1251_v36  ;;  %v504_v35 = vadd.s32 4294967264, %v478_v0 }
 0x23b   :  { %355 = vmax.xlane.f32.xlu1 %v354_v38  ;;  %352 = vmax.xlane.f32.xlu0 %v351_v33  ;;  %v1411_v38 = vsub.s32 %v478_v0, %v1251_v36 }
 0x28c   :  { %v368_v50 = vpop.xlane.xlu1 %367  ;;  %v359_v51 = vpop.xlane.xlu0 %358 }
 0x28d   :  { %v405_v14 = vmul.f32 0.03125, %v359_v51  ;;  %v408_v22 = vmul.f32 0.03125, %v368_v50 }
 0x290   :  { %v314_v53 = vpop.xlane.xlu1 %313  ;;  %v362_v54 = vpop.xlane.xlu0 %361 }
 0x291   :  { %v406_v10 = vmul.f32 0.03125, %v362_v54 }
 0x293   :  { %v437_v21 = vpack.c.bf16 %v406_v10, %v405_v14 }
 0x294   :  { %v320_v55 = vpop.xlane.xlu1 %319  ;;  %v365_v56 = vpop.xlane.xlu0 %364 }
 0x295   :  { %v407_v15 = vmul.f32 0.03125, %v365_v56  ;;  %v461_v33 = vunpack.c.l.b16 %v437_v21  ;;  %v462_v32 = vunpack.c.h.b16 %v437_v21 }
 0x297   :  { %v438_v27 = vpack.c.bf16 %v408_v22, %v407_v15  ;;  %v482_v51 = vrot.slane %v461_v33, %v1411_v38  ;;  %v511_v33 = vadd.s32 4294967256, %v478_v0 }
 0x298   :  { %v374_v57 = vpop.xlane.xlu1 %373  ;;  %v311_v58 = vpop.xlane.xlu0 %310 }
 0x299   :  { %v421_v28 = vpack.c.bf16 %v314_v53, %v311_v58  ;;  %v463_v41 = vunpack.c.l.b16 %v438_v27  ;;  %v487_v53 = vrot.slane %v462_v32, %v1414_v34  ;;  %v464_v54 = vunpack.c.h.b16 %v438_v27 }
 0x29a   :  { %v410_v58 = vmul.f32 0.03125, %v374_v57  ;;  %v518_v27 = vadd.s32 4294967248, %v478_v0 }
 0x29b   :  { %v649_v42 = vunpack.c.l.b16 %v421_v28  ;;  %v650_v45 = vunpack.c.h.b16 %v421_v28  ;;  %v494_v56 = vrot.slane %v463_v41, %v1417_v39  ;;  %v525_v41 = vadd.s32 4294967240, %v478_v0 }
 0x29c   :  { %v326_v60 = vpop.xlane.xlu1 %325  ;;  %v317_v61 = vpop.xlane.xlu0 %316  ;;  %v489_v57 = vsel %vm488_vm6, %v487_v53, %v482_v51  ;;  %v1435_v0 = vsub.s32 %v504_v35, %v1251_v36  ;;  %v1438_v51 = vsub.s32 %v511_v33, %v1251_v36 }
 0x29d   :  { %v422_v37 = vpack.c.bf16 %v320_v55, %v317_v61  ;;  %v668_v61 = vrot.slane %v649_v42, %v1411_v38  ;;  %v672_v15 = vrot.slane %v650_v45, %v1414_v34  ;;  %v496_v45 = vsel %vm495_vm7, %v494_v56, %v489_v57 }
 0x29f   :  { %v651_v50 = vunpack.c.l.b16 %v422_v37  ;;  %v652_v14 = vunpack.c.h.b16 %v422_v37 }
 0x2a0   :  { %v1401_v62 = vpop.xlane.xlu1 %379  ;;  %v371_v63 = vpop.xlane.xlu0 %370 }
 0x2a1   :  { %v409_v55 = vmul.f32 0.03125, %v371_v63  ;;  %v677_v28 = vrot.slane %v651_v50, %v1417_v39 }
 0x2a3   :  { %v439_v63 = vpack.c.bf16 %v410_v58, %v409_v55 }
 0x2a4   :  { %v1403_v13 = vpop.xlane.xlu1 %331  ;;  %v323_v9 = vpop.xlane.xlu0 %322 }
 0x2a5   :  { %v423_v42 = vpack.c.bf16 %v326_v60, %v323_v9  ;;  %v465_v60 = vunpack.c.l.b16 %v439_v63  ;;  %v1441_v9 = vsub.s32 %v518_v27, %v1251_v36 }
 0x2a7   :  { %v654_v57 = vunpack.c.h.b16 %v423_v42 }
 0x2a8   :  { %v1406_v19 = vpop.xlane.xlu0 %376  ;;  %v383_v18 = vpop.xlane.xlu1 %382 }
 0x2a9   :  { %v413_v32 = vmul.f32 0.03125, %v383_v18 }
 0x2ac   :  { %v1408_v29 = vpop.xlane.xlu0 %328  ;;  %v386_v31 = vpop.xlane.xlu1 %385 }
 0x2ad   :  { %v414_v10 = vmul.f32 0.03125, %v386_v31  ;;  %v501_v31 = vrot.slane %v464_v54, %v1420_v6  ;;  %v1444_v54 = vsub.s32 %v525_v41, %v1251_v36  ;;  %v508_v41 = vrot.slane %v465_v60, %v1435_v0 }
 0x2af   :  { %v441_v37 = vpack.c.bf16 %v414_v10, %v413_v32  ;;  %v503_v58 = vsel %vm502_vm8, %v501_v31, %v496_v45 }
 0x2b0   :  { %v389_v46 = vpop.xlane.xlu0 %388  ;;  %v392_v48 = vpop.xlane.xlu1 %391 }
 0x2b1   :  { %v415_v22 = vmul.f32 0.03125, %v389_v46  ;;  %v416_v20 = vmul.f32 0.03125, %v392_v48  ;;  %v673_v46 = vsel %vm488_vm6, %v672_v15, %v668_v61  ;;  %v682_v48 = vrot.slane %v652_v14, %v1420_v6 }
 0x2b2   :  { %v678_v55 = vsel %vm495_vm7, %v677_v28, %v673_v46  ;;  %v653_v61 = vunpack.c.l.b16 %v423_v42  ;;  %v469_v10 = vunpack.c.l.b16 %v441_v37  ;;  %v470_v15 = vunpack.c.h.b16 %v441_v37 }
 0x2b3   :  { %v442_v50 = vpack.c.bf16 %v416_v20, %v415_v22  ;;  %v683_v14 = vsel %vm502_vm8, %v682_v48, %v678_v55  ;;  %v412_v22 = vmul.f32 0.03125, %v1401_v62  ;;  %v411_v20 = vmul.f32 0.03125, %v1406_v19 }
 0x2b4   :  { %v338_v21 = vpop.xlane.xlu1 %337  ;;  %v335_v23 = vpop.xlane.xlu0 %334  ;;  %v687_v37 = vrot.slane %v653_v61, %v1435_v0  ;;  %v535_v45 = vrot.slane %v469_v10, %v1411_v38  ;;  %v539_v62 = vrot.slane %v470_v15, %v1414_v34  ;;  %v424_v48 = vpack.c.bf16 %v1403_v13, %v1408_v29 }
 0x2b5   :  { %v425_v53 = vpack.c.bf16 %v338_v21, %v335_v23  ;;  %v471_v21 = vunpack.c.l.b16 %v442_v50  ;;  %v440_v19 = vpack.c.bf16 %v412_v22, %v411_v20  ;;  %v510_v10 = vsel %vm509_vm9, %v508_v41, %v503_v58 }
 0x2b6   :  { %v688_v13 = vsel %vm509_vm9, %v687_v37, %v683_v14  ;;  %v692_v29 = vrot.slane %v654_v57, %v1438_v51 }
 0x2b7   :  { %v657_v35 = vunpack.c.l.b16 %v425_v53  ;;  %v658_v33 = vunpack.c.h.b16 %v425_v53  ;;  %v544_v55 = vrot.slane %v471_v21, %v1417_v39 }
 0x2b8   :  { %v344_v30 = vpop.xlane.xlu1 %343  ;;  %v341_v18 = vpop.xlane.xlu0 %340  ;;  %v693_v37 = vsel %vm516_vm10, %v692_v29, %v688_v13 }
 0x2b9   :  { %v426_v56 = vpack.c.bf16 %v344_v30, %v341_v18  ;;  %v466_v30 = vunpack.c.h.b16 %v439_v63  ;;  %v472_v18 = vunpack.c.h.b16 %v442_v50  ;;  %v707_v42 = vrot.slane %v657_v35, %v1411_v38 }
 0x2ba   :  { %v711_v60 = vrot.slane %v658_v33, %v1414_v34  ;;  %v540_v50 = vsel %vm488_vm6, %v539_v62, %v535_v45  ;;  %v467_v38 = vunpack.c.l.b16 %v440_v19  ;;  %v468_v45 = vunpack.c.h.b16 %v440_v19 }
 0x2bb   :  { %v659_v31 = vunpack.c.l.b16 %v426_v56  ;;  %v660_v61 = vunpack.c.h.b16 %v426_v56  ;;  %v515_v15 = vrot.slane %v466_v30, %v1438_v51  ;;  %v545_v34 = vsel %vm495_vm7, %v544_v55, %v540_v50 }
 0x2bc   :  { %v398_v23 = vpop.xlane.xlu1 %397  ;;  %v395_v28 = vpop.xlane.xlu0 %394  ;;  %v549_v56 = vrot.slane %v472_v18, %v1420_v6  ;;  %v712_v33 = vsel %vm488_vm6, %v711_v60, %v707_v42  ;;  %v522_v18 = vrot.slane %v467_v38, %v1441_v9  ;;  %v656_v55 = vunpack.c.h.b16 %v424_v48 }
 0x2bd   :  { %v418_v32 = vmul.f32 0.03125, %v398_v23  ;;  %v417_v27 = vmul.f32 0.03125, %v395_v28  ;;  %v716_v22 = vrot.slane %v659_v31, %v1417_v39  ;;  %v655_v28 = vunpack.c.l.b16 %v424_v48 }
 0x2be   :  { %v721_v39 = vrot.slane %v660_v61, %v1420_v6  ;;  %v517_v31 = vsel %vm516_vm10, %v515_v15, %v510_v10  ;;  %v550_v42 = vsel %vm502_vm8, %v549_v56, %v545_v34  ;;  %v529_v48 = vrot.slane %v468_v45, %v1444_v54 }
 0x2bf   :  { %v443_v46 = vpack.c.bf16 %v418_v32, %v417_v27  ;;  %v717_v27 = vsel %vm495_vm7, %v716_v22, %v712_v33  ;;  %v697_v6 = vrot.slane %v655_v28, %v1441_v9  ;;  %v524_v29 = vsel %vm523_vm11, %v522_v18, %v517_v31 }
 0x2c0   :  { %v350_v53 = vpop.xlane.xlu1 %349  ;;  %v347_v63 = vpop.xlane.xlu0 %346  ;;  %v722_v60 = vsel %vm502_vm8, %v721_v39, %v717_v27  ;;  %v702_v50 = vrot.slane %v656_v55, %v1444_v54  ;;  %v531_v33 = vsel %vm530_vm12, %v529_v48, %v524_v29  ;;  %v813_v45 = vstv %s1628_s5 }
 0x2c1   :  { %v427_v23 = vpack.c.bf16 %v350_v53, %v347_v63  ;;  %v473_v20 = vunpack.c.l.b16 %v443_v46  ;;  %v474_v32 = vunpack.c.h.b16 %v443_v46  ;;  %v698_v28 = vsel %vm523_vm11, %v697_v6, %v693_v37 }
 0x2c3   :  { %v661_v21 = vunpack.c.l.b16 %v427_v23  ;;  %v554_v30 = vrot.slane %v473_v20, %v1435_v0  ;;  %v662_v41 = vunpack.c.h.b16 %v427_v23  ;;  %v559_v61 = vrot.slane %v474_v32, %v1438_v51 }
 0x2c4   :  { %v404_v58 = vpop.xlane.xlu1 %403  ;;  %v401_v35 = vpop.xlane.xlu0 %400 }
 0x2c5   :  { %v420_v14 = vmul.f32 0.03125, %v404_v58  ;;  %v419_v57 = vmul.f32 0.03125, %v401_v35  ;;  %v726_v62 = vrot.slane %v661_v21, %v1435_v0  ;;  %v555_v10 = vsel %vm509_vm9, %v554_v30, %v550_v42 }
 0x2c6   :  { %v731_v19 = vrot.slane %v662_v41, %v1438_v51  ;;  %v560_v51 = vsel %vm516_vm10, %v559_v61, %v555_v10 }
 0x2c7   :  { %v444_v46 = vpack.c.bf16 %v420_v14, %v419_v57  ;;  %v727_v22 = vsel %vm509_vm9, %v726_v62, %v722_v60  ;;  %v703_v14 = vsel %vm530_vm12, %v702_v50, %v698_v28 }
 0x2c8   :  { %v356_v53 = vpop.xlane.xlu1 %355  ;;  %v353_v63 = vpop.xlane.xlu0 %352  ;;  %v732_v58 = vsel %vm516_vm10, %v731_v19, %v727_v22  ;;  %v858_v19 = vsub.s32 1, %v1251_v36 }
 0x2c9   :  { %v428_v23 = vpack.c.bf16 %v356_v53, %v353_v63  ;;  %v475_v0 = vunpack.c.l.b16 %v444_v46  ;;  %v476_v15 = vunpack.c.h.b16 %v444_v46 }
 0x2cb   :  { %v663_v20 = vunpack.c.l.b16 %v428_v23  ;;  %v664_v13 = vunpack.c.h.b16 %v428_v23  ;;  %v564_v21 = vrot.slane %v475_v0, %v1441_v9  ;;  %v569_v38 = vrot.slane %v476_v15, %v1444_v54 }
 0x2cd   :  { %v736_v34 = vrot.slane %v663_v20, %v1441_v9  ;;  %v741_v56 = vrot.slane %v664_v13, %v1444_v54  ;;  %v565_v35 = vsel %vm523_vm11, %v564_v21, %v560_v51 }
 0x2ce   :  { %v570_v39 = vsel %vm530_vm12, %v569_v38, %v565_v35 }
 0x2cf   :  { %v737_v32 = vsel %vm523_vm11, %v736_v34, %v732_v58  ;;  %v571_v30 = vsel %vm130_vm2, %v570_v39, %v531_v33  ;;  %v1036_v39 = vld [vmem:[%s1624_s0 + $0x38] sm:$0xff] }
 0x2d0   :  { %v742_v27 = vsel %vm530_vm12, %v741_v56, %v737_v32  ;;  %v572_v54 = vpack.c.b16 %v571_v30, %v571_v30  ;;  %v1035_v56 = vld [vmem:[%s1624_s0 + $0x40] sm:$0xff] }
 0x2d1   :  { %v743_v9 = vsel %vm130_vm2, %v742_v27, %v703_v14  ;;  %v1037_v14 = vld [vmem:[%s1624_s0 + $0x50] sm:$0xff] }
 0x2d2   :  { %v744_v41 = vpack.c.b16 %v743_v9, %v743_v9  ;;  %997 = vmatmul.mubr.msk.bf16.vlgmr.msra.gmra.mrb[4].mxu1 %vm597_vm13, %v572_v54  ;;  %v1038_v54 = vld [vmem:[%s1624_s0 + $0x48] sm:$0xff] }
 0x2d4   :  { %1009 = vmatmul.mubr.msk.bf16.vlgmr.msra.gmra.mrb[4].mxu0 %vm597_vm13, %v744_v41 }
 0x3a5   :  { %v635_v57 = vpop.f32.mrb[4].mxu1 }
 0x3a6   :  { %v998_v31 = vpop.f32.mrb[5].mxu1 }
 0x3a7   :  { %v806_v37 = vpop.f32.mrb[4].mxu0  ;;  %v638_v62 = vpop.f32.mrb[6].mxu1 }
 0x3a8   :  { %v807_v18 = vadd.f32 %v806_v37, %v635_v57  ;;  %v1010_v55 = vpop.f32.mrb[5].mxu0  ;;  %v999_v6 = vpop.f32.mrb[7].mxu1  ;;  %v1039_v57 = vld [vmem:[%s1624_s0 + $0x60] sm:$0xff]  ;;  %v1040_v62 = vld [vmem:[%s1624_s0 + $0x58] sm:$0xff] }
 0x3a9   :  { %v809_v46 = vpop.f32.mrb[6].mxu0  ;;  %v1041_v55 = vld [vmem:[%s1624_s0 + $0x70] sm:$0xff] }
 0x3aa   :  { %v814_v53 = vadd.f32 %v813_v45, %v807_v18  ;;  %v1011_v63 = vpop.f32.mrb[7].mxu0 }
 0x3ac   :  { %v958_v42 = vmul.f32 -1.442695, %v814_v53 }
 0x3ae   :  { %1029 = vpow2.f32 %v958_v42  ;;  %v1632_v42 = vld [vmem:[#allocation3_spill] sm:$0xff] }
 0x3b8   :  { %v1030_v60 = vpop.eup %1029 }
 0x3b9   :  { %v818_v61 = vadd.f32 1.0, %v1030_v60 }
 0x3bb   :  { %1031 = vrcp.f32 %v818_v61  ;;  %v1043_v61 = vld [vmem:[%s1624_s0 + $0x78] sm:$0xff] }
 0x3c5   :  { %v1032_v23 = vpop.eup %1031 }
 0x3c6   :  { %v824_v10 = vrot.slane %v1032_v23, %v1255_v40  ;;  %v859_v0 = vrot.slane %v1032_v23, %v858_v19 }
 0x3c8   :  { %830 = vbcast.lane.b32.xlu1 %v824_v10, 264  ;;  %826 = vbcast.lane.b32.xlu0 %v824_v10, 256 }
 0x3cc   :  { %834 = vbcast.lane.b32.xlu1 %v824_v10, 272  ;;  %842 = vbcast.lane.b32.xlu0 %v824_v10, 288 }
 0x3d0   :  { %838 = vbcast.lane.b32.xlu1 %v824_v10, 280  ;;  %850 = vbcast.lane.b32.xlu0 %v824_v10, 304 }
 0x3d4   :  { %846 = vbcast.lane.b32.xlu1 %v824_v10, 296  ;;  %861 = vbcast.lane.b32.xlu0 %v859_v0, 256 }
 0x3d8   :  { %854 = vbcast.lane.b32.xlu1 %v824_v10, 312  ;;  %869 = vbcast.lane.b32.xlu0 %v859_v0, 272 }
 0x3dc   :  { %865 = vbcast.lane.b32.xlu1 %v859_v0, 264  ;;  %877 = vbcast.lane.b32.xlu0 %v859_v0, 288 }
 0x3e0   :  { %873 = vbcast.lane.b32.xlu1 %v859_v0, 280  ;;  %885 = vbcast.lane.b32.xlu0 %v859_v0, 304 }
 0x3e4   :  { %881 = vbcast.lane.b32.xlu1 %v859_v0, 296 }
 0x3e8   :  { %889 = vbcast.lane.b32.xlu1 %v859_v0, 312 }
 0x43a   :  { %v831_v40 = vpop.permute.xlu1 %830  ;;  %v827_v15 = vpop.permute.xlu0 %826 }
 0x43b   :  { %v892_v48 = vmul.f32 %v831_v40, %v1269_v47  ;;  %v891_v22 = vmul.f32 %v827_v15, %v1262_v44 }
 0x43d   :  { %v908_v36 = vadd.f32 %v892_v48, %v1102_v4  ;;  %v907_v20 = vadd.f32 %v891_v22, %v1097_v3 }
 0x43e   :  { %v835_v13 = vpop.permute.xlu1 %834  ;;  %v843_v29 = vpop.permute.xlu0 %842 }
 0x43f   :  { %924 = vst.msk [vmem:[%s1629_s6 + $0x8] sm:$0xff] %vm41_vm1, %v908_v36  ;;  %923 = vst.msk [vmem:[%s1629_s6] sm:$0xff] %vm41_vm1, %v907_v20  ;;  %v893_v47 = vmul.f32 %v835_v13, %v1276_v49  ;;  %v895_v44 = vmul.f32 %v843_v29, %v1297_v59 }
 0x441   :  { %v909_v4 = vadd.f32 %v893_v47, %v1107_v5  ;;  %v911_v3 = vadd.f32 %v895_v44, %v1118_v7  ;;  %v1033_v5 = vld [vmem:[%s1624_s0 + $0x18] sm:$0xff] }
 0x442   :  { %v839_v50 = vpop.permute.xlu1 %838  ;;  %v851_v21 = vpop.permute.xlu0 %850 }
 0x443   :  { %925 = vst.msk [vmem:[%s1629_s6 + $0x10] sm:$0xff] %vm41_vm1, %v909_v4  ;;  %927 = vst.msk [vmem:[%s1629_s6 + $0x20] sm:$0xff] %vm41_vm1, %v911_v3  ;;  %v894_v49 = vmul.f32 %v839_v50, %v1259_v43  ;;  %v897_v59 = vmul.f32 %v851_v21, %v1309_v1 }
 0x445   :  { %v910_v7 = vadd.f32 %v1033_v5, %v894_v49  ;;  %v913_v38 = vadd.f32 %v897_v59, %v1134_v12  ;;  %v1034_v12 = vld [vmem:[%s1624_s0 + $0x28] sm:$0xff] }
 0x446   :  { %v847_v28 = vpop.permute.xlu1 %846  ;;  %v862_v51 = vpop.permute.xlu0 %861 }
 0x447   :  { %926 = vst.msk [vmem:[%s1629_s6 + $0x18] sm:$0xff] %vm41_vm1, %v910_v7  ;;  %929 = vst.msk [vmem:[%s1629_s6 + $0x30] sm:$0xff] %vm41_vm1, %v913_v38  ;;  %v896_v43 = vmul.f32 %v847_v28, %v1283_v52  ;;  %v899_v1 = vmul.f32 %v862_v51, %v1312_v2 }
 0x449   :  { %v912_v34 = vadd.f32 %v1034_v12, %v896_v43  ;;  %v915_v58 = vadd.f32 %v1035_v56, %v899_v1 }
 0x44a   :  { %v855_v35 = vpop.permute.xlu1 %854  ;;  %v870_v33 = vpop.permute.xlu0 %869 }
 0x44b   :  { %928 = vst.msk [vmem:[%s1629_s6 + $0x28] sm:$0xff] %vm41_vm1, %v912_v34  ;;  %931 = vst.msk [vmem:[%s1629_s6 + $0x40] sm:$0xff] %vm41_vm1, %v915_v58  ;;  %v898_v52 = vmul.f32 %v855_v35, %v1294_v8  ;;  %v901_v2 = vmul.f32 %v870_v33, %v1326_v16 }
 0x44d   :  { %v914_v32 = vadd.f32 %v1036_v39, %v898_v52  ;;  %v917_v27 = vadd.f32 %v1037_v14, %v901_v2 }
 0x44e   :  { %v866_v30 = vpop.permute.xlu1 %865  ;;  %v878_v9 = vpop.permute.xlu0 %877 }
 0x44f   :  { %930 = vst.msk [vmem:[%s1629_s6 + $0x38] sm:$0xff] %vm41_vm1, %v914_v32  ;;  %933 = vst.msk [vmem:[%s1629_s6 + $0x50] sm:$0xff] %vm41_vm1, %v917_v27  ;;  %v900_v8 = vmul.f32 %v866_v30, %v1319_v11  ;;  %v903_v16 = vmul.f32 %v878_v9, %v1347_v25 }
 0x451   :  { %v916_v41 = vadd.f32 %v1038_v54, %v900_v8  ;;  %v919_v31 = vadd.f32 %v1039_v57, %v903_v16 }
 0x452   :  { %v874_v37 = vpop.permute.xlu1 %873  ;;  %v886_v45 = vpop.permute.xlu0 %885 }
 0x453   :  { %932 = vst.msk [vmem:[%s1629_s6 + $0x48] sm:$0xff] %vm41_vm1, %v916_v41  ;;  %935 = vst.msk [vmem:[%s1629_s6 + $0x60] sm:$0xff] %vm41_vm1, %v919_v31  ;;  %v902_v11 = vmul.f32 %v874_v37, %v1329_v17  ;;  %v905_v25 = vmul.f32 %v886_v45, %v1361_v26  ;;  %v1042_v26 = vld [vmem:[%s1624_s0 + $0x68] sm:$0xff] }
 0x455   :  { %v918_v18 = vadd.f32 %v1040_v62, %v902_v11  ;;  %v921_v6 = vadd.f32 %v1041_v55, %v905_v25 }
 0x456   :  { %v882_v46 = vpop.permute.xlu1 %881 }
 0x457   :  { %934 = vst.msk [vmem:[%s1629_s6 + $0x58] sm:$0xff] %vm41_vm1, %v918_v18  ;;  %937 = vst.msk [vmem:[%s1629_s6 + $0x70] sm:$0xff] %vm41_vm1, %v921_v6  ;;  %v904_v17 = vmul.f32 %v882_v46, %v1344_v24 }
 0x459   :  { %v920_v53 = vadd.f32 %v1042_v26, %v904_v17 }
 0x45a   :  { %v890_v63 = vpop.permute.xlu1 %889 }
 0x45b   :  { %936 = vst.msk [vmem:[%s1629_s6 + $0x68] sm:$0xff] %vm41_vm1, %v920_v53  ;;  %v906_v60 = vmul.f32 %v890_v63, %v1632_v42 }
 0x45d   :  { %v922_v23 = vadd.f32 %v1043_v61, %v906_v60 }
 0x45f   :  { %938 = vst.msk [vmem:[%s1629_s6 + $0x78] sm:$0xff] %vm41_vm1, %v922_v23 }

</bundles_post_ra>
